<compile_context>
chip_gen: v7x
topology: tpu7x:2x2x1
jax: 0.10.0
libtpu: 0.0.40
codegen_flags: <defaults>
</compile_context>

<pallas_src>
import jax
import jax.numpy as jnp
from jax.experimental import pallas as pl
from jax.experimental.pallas import tpu as pltpu

LANE = 128      # lane width: pad all feature dims to a multiple of this
SUBLANE = 8     # sublane width: batch tiles are multiples of this
MAX_TB = 256    # target batch-tile rows (per review: 256-512)


def _round_up(n, m):
    return ((n + m - 1) // m) * m


def _silu(x):
    return x * jax.nn.sigmoid(x)


def qfunction_kernel(x_ref, w1_ref, b1_ref, w2_ref, b2_ref, w3_ref, b3_ref,
                     o_ref):
    # bf16 operands, f32 accumulation, f32 activations/bias, f32 output.
    x = x_ref[...]
    h1 = jnp.dot(x, w1_ref[...], preferred_element_type=jnp.float32) + b1_ref[...]
    h1 = _silu(h1)
    h2 = jnp.dot(h1.astype(jnp.bfloat16), w2_ref[...],
                 preferred_element_type=jnp.float32) + b2_ref[...]
    h2 = _silu(h2)
    q = jnp.dot(h2.astype(jnp.bfloat16), w3_ref[...],
                preferred_element_type=jnp.float32) + b3_ref[...]
    o_ref[...] = q.astype(o_ref.dtype)


def prepare_params(params):
    """Pad feature dims to multiples of 128 lanes and cast weights to bf16.

    Zero padding is semantics-preserving: padded input columns hit zero weight
    rows, padded hidden columns are silu(0)=0 and feed zero weight rows of the
    next layer, and padded output columns are sliced off by the wrapper.
    """
    w1, b1, w2, b2, w3, b3 = params
    obs, h1 = w1.shape
    _, h2 = w2.shape
    _, na = w3.shape
    obs_p = _round_up(obs, LANE)
    h1_p = _round_up(h1, LANE)
    h2_p = _round_up(h2, LANE)
    na_p = _round_up(na, LANE)

    def pad2(a, r, c):
        return jnp.pad(a, ((0, r - a.shape[0]), (0, c - a.shape[1])))

    padded = (
        pad2(w1, obs_p, h1_p).astype(jnp.bfloat16),
        pad2(b1, 1, h1_p).astype(jnp.float32),
        pad2(w2, h1_p, h2_p).astype(jnp.bfloat16),
        pad2(b2, 1, h2_p).astype(jnp.float32),
        pad2(w3, h2_p, na_p).astype(jnp.bfloat16),
        pad2(b3, 1, na_p).astype(jnp.float32),
    )
    dims = dict(obs=obs, obs_p=obs_p, na=na, na_p=na_p)
    return padded, dims


def qfunction_forward(x, padded_params, dims):
    """Runs the MLP with a batch-tiled grid and VMEM-resident weights."""
    w1p, b1p, w2p, b2p, w3p, b3p = padded_params
    B = x.shape[0]
    obs, obs_p = dims["obs"], dims["obs_p"]
    na, na_p = dims["na"], dims["na_p"]

    # Batch tile: multiple of 8 sublanes, capped at MAX_TB rows.
    tb = min(MAX_TB, _round_up(B, SUBLANE))
    b_pad = _round_up(B, tb)
    grid = (pl.cdiv(b_pad, tb),)

    # Pad x: zero rows (sliced off later) + zero feature columns (hit zero
    # weight rows), cast to bf16 for the MXU.
    x_p = jnp.pad(x, ((0, b_pad - B), (0, obs_p - obs))).astype(jnp.bfloat16)

    def resident(a):
        # Whole-array block, constant index_map -> DMA'd once, stays in VMEM.
        return pl.BlockSpec(a.shape, lambda i: tuple(0 for _ in a.shape))

    out_shape = jax.ShapeDtypeStruct((b_pad, na_p), jnp.float32)
    q_p = pl.pallas_call(
        qfunction_kernel,
        out_shape=out_shape,
        grid=grid,
        in_specs=[
            pl.BlockSpec((tb, obs_p), lambda i: (i, 0)),
            resident(w1p), resident(b1p),
            resident(w2p), resident(b2p),
            resident(w3p), resident(b3p),
        ],
        out_specs=pl.BlockSpec((tb, na_p), lambda i: (i, 0)),
        compiler_params=pltpu.CompilerParams(
            dimension_semantics=("parallel",)),
    )(x_p, w1p, b1p, w2p, b2p, w3p, b3p)

    # Strip batch and lane padding.
    return q_p[:B, :na]


def init_params(key, obs_size, hidden1, hidden2, n_actions):
    """Deterministic synthetic init (uniform, PyTorch-Linear-like scaling)."""
    ks = jax.random.split(key, 6)

    def lin(kw, kb, fan_in, fan_out):
        bound = 1.0 / jnp.sqrt(fan_in)
        w = jax.random.uniform(kw, (fan_in, fan_out), jnp.float32, -bound, bound)
        b = jax.random.uniform(kb, (1, fan_out), jnp.float32, -bound, bound)
        return w, b

    w1, b1 = lin(ks[0], ks[1], obs_size, hidden1)
    w2, b2 = lin(ks[2], ks[3], hidden1, hidden2)
    w3, b3 = lin(ks[4], ks[5], hidden2, n_actions)
    return (w1, b1, w2, b2, w3, b3)


def reference_forward(x, params):
    w1, b1, w2, b2, w3, b3 = params
    h1 = _silu(x @ w1 + b1)
    h2 = _silu(h1 @ w2 + b2)
    return h2 @ w3 + b3


if __name__ == "__main__":
    # config: n_cand = 8 -> obs_size = 16, n_actions = 8; hidden sizes 32/32.
    n_cand = 8
    obs_size = n_cand * 2
    n_actions = n_cand
    hidden1, hidden2 = 32, 32
    batch = 2

    key = jax.random.PRNGKey(0)
    k_x, k_p = jax.random.split(key)
    x = jax.random.normal(k_x, (batch, obs_size), jnp.float32)
    params = init_params(k_p, obs_size, hidden1, hidden2, n_actions)

    padded_params, dims = prepare_params(params)
    q = qfunction_forward(x, padded_params, dims)
    q = jax.block_until_ready(q)

    q_ref = reference_forward(x, params)
    assert q.shape == (batch, n_actions)
    # bf16 matmul operands (f32 accumulation) -> looser tolerance than pure f32.
    assert jnp.allclose(q, q_ref, atol=3e-2, rtol=3e-2), "mismatch vs reference"

    print("KERNEL_OK")
</pallas_src>

<mosaic_0001>
module attributes {stable_mosaic.version = 11 : i64} {
  func.func @qfunction_kernel(%arg0: i32, %arg1: memref<8x128xbf16, #tpu.memory_space<vmem>>, %arg2: memref<128x128xbf16, #tpu.memory_space<vmem>>, %arg3: memref<1x128xf32, #tpu.memory_space<vmem>>, %arg4: memref<128x128xbf16, #tpu.memory_space<vmem>>, %arg5: memref<1x128xf32, #tpu.memory_space<vmem>>, %arg6: memref<128x128xbf16, #tpu.memory_space<vmem>>, %arg7: memref<1x128xf32, #tpu.memory_space<vmem>>, %arg8: memref<8x128xf32, #tpu.memory_space<vmem>>) attributes {dimension_semantics = [#tpu.dimension_semantics<parallel>], iteration_bounds = array<i64: 1>, scalar_prefetch = 0 : i64, scratch_operands = 0 : i64, tpu.core_type = #tpu.core_type<tc>, window_params = [{transform_indices = @transform_0, window_bounds = array<i64: 8, 128>}, {pipeline_mode = #tpu.pipeline_mode<synchronous>, transform_indices = @transform_1, window_bounds = array<i64: 128, 128>}, {pipeline_mode = #tpu.pipeline_mode<synchronous>, transform_indices = @transform_2, window_bounds = array<i64: 1, 128>}, {pipeline_mode = #tpu.pipeline_mode<synchronous>, transform_indices = @transform_3, window_bounds = array<i64: 128, 128>}, {pipeline_mode = #tpu.pipeline_mode<synchronous>, transform_indices = @transform_4, window_bounds = array<i64: 1, 128>}, {pipeline_mode = #tpu.pipeline_mode<synchronous>, transform_indices = @transform_5, window_bounds = array<i64: 128, 128>}, {pipeline_mode = #tpu.pipeline_mode<synchronous>, transform_indices = @transform_6, window_bounds = array<i64: 1, 128>}, {transform_indices = @transform_7, window_bounds = array<i64: 8, 128>}]} {
    %c0 = arith.constant 0 : index
    %c0_0 = arith.constant 0 : index
    %0 = vector.load %arg1[%c0, %c0_0] : memref<8x128xbf16, #tpu.memory_space<vmem>>, vector<8x128xbf16>
    %c0_1 = arith.constant 0 : index
    %c0_2 = arith.constant 0 : index
    %1 = vector.load %arg2[%c0_1, %c0_2] : memref<128x128xbf16, #tpu.memory_space<vmem>>, vector<128x128xbf16>
    %cst = arith.constant dense<0.000000e+00> : vector<8x128xf32>
    %2 = tpu.matmul %0, %1, %cst {dimension_numbers = #tpu.dot_dimension_numbers<[1], [0], [0], [1], [0, 0, 1, 1], [], []>} : vector<8x128xbf16>, vector<128x128xbf16>, vector<8x128xf32> -> vector<8x128xf32>
    %c0_3 = arith.constant 0 : index
    %c0_4 = arith.constant 0 : index
    %3 = vector.load %arg3[%c0_3, %c0_4] : memref<1x128xf32, #tpu.memory_space<vmem>>, vector<1x128xf32>
    %4 = vector.broadcast %3 : vector<1x128xf32> to vector<8x128xf32>
    %5 = arith.addf %2, %4 : vector<8x128xf32>
    %6 = arith.negf %5 : vector<8x128xf32>
    %7 = math.exp %6 : vector<8x128xf32>
    %cst_5 = arith.constant 1.000000e+00 : f32
    %8 = vector.broadcast %cst_5 : f32 to vector<8x128xf32>
    %9 = arith.addf %8, %7 : vector<8x128xf32>
    %10 = arith.divf %8, %9 : vector<8x128xf32>
    %11 = arith.mulf %5, %10 : vector<8x128xf32>
    %12 = arith.truncf %11 : vector<8x128xf32> to vector<8x128xbf16>
    %c0_6 = arith.constant 0 : index
    %c0_7 = arith.constant 0 : index
    %13 = vector.load %arg4[%c0_6, %c0_7] : memref<128x128xbf16, #tpu.memory_space<vmem>>, vector<128x128xbf16>
    %cst_8 = arith.constant dense<0.000000e+00> : vector<8x128xf32>
    %14 = tpu.matmul %12, %13, %cst_8 {dimension_numbers = #tpu.dot_dimension_numbers<[1], [0], [0], [1], [0, 0, 1, 1], [], []>} : vector<8x128xbf16>, vector<128x128xbf16>, vector<8x128xf32> -> vector<8x128xf32>
    %c0_9 = arith.constant 0 : index
    %c0_10 = arith.constant 0 : index
    %15 = vector.load %arg5[%c0_9, %c0_10] : memref<1x128xf32, #tpu.memory_space<vmem>>, vector<1x128xf32>
    %16 = vector.broadcast %15 : vector<1x128xf32> to vector<8x128xf32>
    %17 = arith.addf %14, %16 : vector<8x128xf32>
    %18 = arith.negf %17 : vector<8x128xf32>
    %19 = math.exp %18 : vector<8x128xf32>
    %cst_11 = arith.constant 1.000000e+00 : f32
    %20 = vector.broadcast %cst_11 : f32 to vector<8x128xf32>
    %21 = arith.addf %20, %19 : vector<8x128xf32>
    %22 = arith.divf %20, %21 : vector<8x128xf32>
    %23 = arith.mulf %17, %22 : vector<8x128xf32>
    %24 = arith.truncf %23 : vector<8x128xf32> to vector<8x128xbf16>
    %c0_12 = arith.constant 0 : index
    %c0_13 = arith.constant 0 : index
    %25 = vector.load %arg6[%c0_12, %c0_13] : memref<128x128xbf16, #tpu.memory_space<vmem>>, vector<128x128xbf16>
    %cst_14 = arith.constant dense<0.000000e+00> : vector<8x128xf32>
    %26 = tpu.matmul %24, %25, %cst_14 {dimension_numbers = #tpu.dot_dimension_numbers<[1], [0], [0], [1], [0, 0, 1, 1], [], []>} : vector<8x128xbf16>, vector<128x128xbf16>, vector<8x128xf32> -> vector<8x128xf32>
    %c0_15 = arith.constant 0 : index
    %c0_16 = arith.constant 0 : index
    %27 = vector.load %arg7[%c0_15, %c0_16] : memref<1x128xf32, #tpu.memory_space<vmem>>, vector<1x128xf32>
    %28 = vector.broadcast %27 : vector<1x128xf32> to vector<8x128xf32>
    %29 = arith.addf %26, %28 : vector<8x128xf32>
    %c0_17 = arith.constant 0 : index
    %c0_18 = arith.constant 0 : index
    %30 = vector.load %arg8[%c0_17, %c0_18] : memref<8x128xf32, #tpu.memory_space<vmem>>, vector<8x128xf32>
    tpu.vector_store %arg8[%c0_17, %c0_18], %29 {strides = array<i32>} : memref<8x128xf32, #tpu.memory_space<vmem>>, vector<8x128xf32>,
    return
  }
  func.func @transform_0(%arg0: i32) -> (i32, i32) {
    %c0_i32 = arith.constant 0 : i32
    %c0_i32_0 = arith.constant 0 : i32
    return %arg0, %c0_i32 : i32, i32
  }
  func.func @transform_1(%arg0: i32) -> (i32, i32) {
    %c0_i32 = arith.constant 0 : i32
    %c0_i32_0 = arith.constant 0 : i32
    %c0_i32_1 = arith.constant 0 : i32
    return %c0_i32, %c0_i32_0 : i32, i32
  }
  func.func @transform_2(%arg0: i32) -> (i32, i32) {
    %c0_i32 = arith.constant 0 : i32
    %c0_i32_0 = arith.constant 0 : i32
    %c0_i32_1 = arith.constant 0 : i32
    return %c0_i32, %c0_i32_0 : i32, i32
  }
  func.func @transform_3(%arg0: i32) -> (i32, i32) {
    %c0_i32 = arith.constant 0 : i32
    %c0_i32_0 = arith.constant 0 : i32
    %c0_i32_1 = arith.constant 0 : i32
    return %c0_i32, %c0_i32_0 : i32, i32
  }
  func.func @transform_4(%arg0: i32) -> (i32, i32) {
    %c0_i32 = arith.constant 0 : i32
    %c0_i32_0 = arith.constant 0 : i32
    %c0_i32_1 = arith.constant 0 : i32
    return %c0_i32, %c0_i32_0 : i32, i32
  }
  func.func @transform_5(%arg0: i32) -> (i32, i32) {
    %c0_i32 = arith.constant 0 : i32
    %c0_i32_0 = arith.constant 0 : i32
    %c0_i32_1 = arith.constant 0 : i32
    return %c0_i32, %c0_i32_0 : i32, i32
  }
  func.func @transform_6(%arg0: i32) -> (i32, i32) {
    %c0_i32 = arith.constant 0 : i32
    %c0_i32_0 = arith.constant 0 : i32
    %c0_i32_1 = arith.constant 0 : i32
    return %c0_i32, %c0_i32_0 : i32, i32
  }
  func.func @transform_7(%arg0: i32) -> (i32, i32) {
    %c0_i32 = arith.constant 0 : i32
    %c0_i32_0 = arith.constant 0 : i32
    return %arg0, %c0_i32 : i32, i32
  }
}

</mosaic_0001>

<bundles_post_ra>
// kernel: tpu_custom_call.1
= control target key start
LH: loop header
LB: loop body
LE: loop exit
PB: predicated region body
PF: predicated region fallthrough
CT: control target
= control target key end

     0   :  { %12 = vsyncpa [#allocation3], 0  ;;  %s881_s0 = inlined_call_operand.hbm [shape: bf16[8,128], index: 0, kind: input, shape index: {}]   ;;  %s882_s1 = inlined_call_operand.hbm [shape: bf16[128,128], index: 1, kind: input, shape index: {}]   ;;  %s883_s2 = inlined_call_operand.vmem [shape: f32[1,128], index: 2, kind: input, shape index: {}]   ;;  %s884_s3 = inlined_call_operand.hbm [shape: bf16[128,128], index: 3, kind: input, shape index: {}]   ;;  %s885_s4 = inlined_call_operand.vmem [shape: f32[1,128], index: 4, kind: input, shape index: {}]   ;;  %s886_s5 = inlined_call_operand.hbm [shape: bf16[128,128], index: 5, kind: input, shape index: {}]   ;;  %s887_s6 = inlined_call_operand.vmem [shape: f32[1,128], index: 6, kind: input, shape index: {}]   ;;  %s888_s7 = inlined_call_operand.hbm [shape: f32[8,128], index: 7, kind: output, shape index: {}]  }
   0x1   :  { %13 = vsyncpa [#allocation6], 0 }
   0x2   :  { %14 = vsyncpa [#allocation9], 0 }
   0x3   :  { %15 = vsyncpa [#allocation4], 0  ;;  %s724_s24 = smov [#allocation5]   ;;  %s606_s28 = scalar_lea.hbm %s882_s1, 1024 }
   0x4   :  { %s31_s25 = sshll.u32 %s724_s24, 4  ;;  %p607_p0 = scmp.ne.s32.totalorder %s882_s1, %s606_s28  ;;  %s32_s25 = int_to_ptr.vmem [resolvable:$true] %s31_s25 }
   0x5   :  { %p610_p1 = scmp.lt.u32.totalorder %s606_s28, %s882_s1 }
   0x7   :  { %p612_p2 = pnand %p610_p1, %p607_p0 }
   0x9   :  { %615 = shalt.err (!%p612_p2)
}
   0xa   :  { %s616_s10 = scalar_lea.vmem %s32_s25, 1024  ;;  %p621_p4 = scmp.lt.s32.totalorder %s32_s25, %s32_s25 }
   0xb   :  { %p617_p3 = scmp.ne.s32.totalorder %s32_s25, %s616_s10  ;;  %p622_p5 = scmp.lt.s32.totalorder %s616_s10, %s616_s10 }
   0xd   :  { %p623_p6 = por %p622_p5, %p621_p4 }
   0xf   :  { %p624_p7 = pnand %p623_p6, %p617_p3 }
  0x11   :  { %627 = shalt.err (!%p624_p7)
}
  0x12   :  { %s725_s11 = smov 64   ;;  %s726_s12 = smov 4  }
  0x13   :  { %37 = dma.hbm_to_vmem [thread:$0]  %s882_s1, 1024, %s32_s25, [#allocation6], %s725_s11, %s725_s11, %s726_s12  }
  0x14   :  { %s727_s15 = smov [#allocation2]   ;;  %s728_s17 = smov [#allocation7]  }
  0x15   :  { %s22_s16 = sshll.u32 %s727_s15, 4  ;;  %s45_s18 = sshll.u32 %s728_s17, 4  ;;  %s23_s16 = int_to_ptr.vmem [resolvable:$true] %s22_s16  ;;  %s46_s18 = int_to_ptr.vmem [resolvable:$true] %s45_s18 }
  0x16   :  { %s628_s21 = scalar_lea.hbm %s881_s0, 64 }
  0x17   :  { %p629_p8 = scmp.ne.s32.totalorder %s881_s0, %s628_s21  ;;  %p632_p9 = scmp.lt.u32.totalorder %s628_s21, %s881_s0 }
  0x19   :  { %p634_p10 = pnand %p632_p9, %p629_p8 }
  0x1b   :  { %637 = shalt.err (!%p634_p10)
}
  0x1c   :  { %s638_s1 = scalar_lea.vmem %s23_s16, 64  ;;  %p643_p12 = scmp.lt.s32.totalorder %s23_s16, %s23_s16 }
  0x1d   :  { %p639_p11 = scmp.ne.s32.totalorder %s23_s16, %s638_s1  ;;  %p644_p13 = scmp.lt.s32.totalorder %s638_s1, %s638_s1 }
  0x1f   :  { %p645_p0 = por %p644_p13, %p643_p12 }
  0x21   :  { %p646_p1 = pnand %p645_p0, %p639_p11 }
  0x23   :  { %649 = shalt.err (!%p646_p1)
}
  0x24   :  { %25 = dma.hbm_to_vmem [thread:$0]  %s881_s0, 64, %s23_s16, [#allocation3]  }
  0x25   :  { %s650_s30 = scalar_lea.hbm %s884_s3, 1024 }
  0x26   :  { %p651_p2 = scmp.ne.s32.totalorder %s884_s3, %s650_s30  ;;  %p654_p3 = scmp.lt.u32.totalorder %s650_s30, %s884_s3 }
  0x28   :  { %p656_p4 = pnand %p654_p3, %p651_p2 }
  0x2a   :  { %659 = shalt.err (!%p656_p4)
}
  0x2b   :  { %s660_s14 = scalar_lea.vmem %s46_s18, 1024  ;;  %p665_p6 = scmp.lt.s32.totalorder %s46_s18, %s46_s18 }
  0x2c   :  { %p661_p5 = scmp.ne.s32.totalorder %s46_s18, %s660_s14  ;;  %p666_p7 = scmp.lt.s32.totalorder %s660_s14, %s660_s14 }
  0x2e   :  { %p667_p8 = por %p666_p7, %p665_p6 }
  0x30   :  { %p668_p9 = pnand %p667_p8, %p661_p5 }
  0x32   :  { %671 = shalt.err (!%p668_p9)
}
  0x33   :  { %51 = dma.hbm_to_vmem [thread:$0]  %s884_s3, 1024, %s46_s18, [#allocation6], %s725_s11, %s725_s11, %s726_s12  }
  0x34   :  { %s729_s16 = smov [#allocation8]   ;;  %s672_s21 = scalar_lea.hbm %s886_s5, 1024 }
  0x35   :  { %s59_s17 = sshll.u32 %s729_s16, 4  ;;  %p673_p10 = scmp.ne.s32.totalorder %s886_s5, %s672_s21  ;;  %s60_s17 = int_to_ptr.vmem [resolvable:$true] %s59_s17 }
  0x36   :  { %p676_p11 = scmp.lt.u32.totalorder %s672_s21, %s886_s5 }
  0x38   :  { %p678_p12 = pnand %p676_p11, %p673_p10 }
  0x3a   :  { %681 = shalt.err (!%p678_p12)
}
  0x3b   :  { %s682_s1 = scalar_lea.vmem %s60_s17, 1024  ;;  %p687_p0 = scmp.lt.s32.totalorder %s60_s17, %s60_s17 }
  0x3c   :  { %p683_p13 = scmp.ne.s32.totalorder %s60_s17, %s682_s1  ;;  %p688_p1 = scmp.lt.s32.totalorder %s682_s1, %s682_s1 }
  0x3e   :  { %p689_p2 = por %p688_p1, %p687_p0 }
  0x40   :  { %p690_p3 = pnand %p689_p2, %p683_p13 }
  0x42   :  { %693 = shalt.err (!%p690_p3)
}
  0x43   :  { %65 = dma.hbm_to_vmem [thread:$0]  %s886_s5, 1024, %s60_s17, [#allocation9], %s725_s11, %s725_s11, %s726_s12  }
  0x44   :  { %716 = dma.done.wait [#allocation3], 64  }
  0x45   :  { %717 = vsyncadd [#allocation3], 4294967232 }
  0x46   :  { %718 = dma.done.wait [#allocation6], 2048  }
  0x47   :  { %719 = vsyncadd [#allocation6], 4294965248 }
  0x48   :  { %720 = dma.done.wait [#allocation9], 1024  }
  0x49   :  { %721 = vsyncadd [#allocation9], 4294966272  ;;  %v730_v0 = vmov 0.0   ;;  %vm731_vm0 = vmmov 0   ;;  %v574_v1 = vld [vmem:[#allocation5] sm:$0xff]   ;;  %v575_v2 = vld [vmem:[#allocation5 + $0x8] sm:$0xff]  }
  0x4a   :  { %505 = vmatprep.subr.bf16.mxu0 %v730_v0  ;;  %521 = vmatprep.mubr.msk.bf16.mxu0 %vm731_vm0, %v730_v0  ;;  %v576_v3 = vld [vmem:[#allocation5 + $0x10] sm:$0xff]   ;;  %v577_v4 = vld [vmem:[#allocation5 + $0x18] sm:$0xff]   ;;  %v578_v5 = vld [vmem:[#allocation5 + $0x20] sm:$0xff]   ;;  %s732_s28 = smov [#allocation10]  }
  0x4b   :  { %525 = vmatprep.subr.bf16.mxu1 %v730_v0  ;;  %541 = vmatprep.mubr.msk.bf16.mxu1 %vm731_vm0, %v730_v0  ;;  %v579_v6 = vld [vmem:[#allocation5 + $0x28] sm:$0xff]   ;;  %v580_v7 = vld [vmem:[#allocation5 + $0x30] sm:$0xff]   ;;  %v581_v8 = vld [vmem:[#allocation5 + $0x38] sm:$0xff]  }
  0x4c   :  { %506 = vmatpush3.bf16.msra.mxu0 %v574_v1  ;;  %v81_v9 = vld [vmem:[#allocation2] sm:$0xf]  ;;  %v582_v10 = vld [vmem:[#allocation7] sm:$0xff]   ;;  %v583_v11 = vld [vmem:[#allocation7 + $0x8] sm:$0xff]  }
  0x4d   :  { %507 = vmatprep.subr.bf16.mxu0 %v730_v0  ;;  %526 = vmatpush3.bf16.msra.mxu1 %v582_v10  ;;  %v584_v12 = vld [vmem:[#allocation7 + $0x10] sm:$0xff]   ;;  %v585_v13 = vld [vmem:[#allocation7 + $0x18] sm:$0xff]   ;;  %v586_v14 = vld [vmem:[#allocation7 + $0x20] sm:$0xff]  }
  0x4e   :  { %527 = vmatprep.subr.bf16.mxu1 %v730_v0  ;;  %v587_v15 = vld [vmem:[#allocation7 + $0x28] sm:$0xff]   ;;  %v588_v16 = vld [vmem:[#allocation7 + $0x30] sm:$0xff]   ;;  %v589_v17 = vld [vmem:[#allocation7 + $0x38] sm:$0xff]  }
  0x4f   :  { %v449_v18 = vld [vmem:[%s883_s2] ss:$0 sm:$0xff]  ;;  %v590_v30 = vld [vmem:[#allocation8] sm:$0xff]   ;;  %v591_v31 = vld [vmem:[#allocation8 + $0x8] sm:$0xff]  }
  0x50   :  { %508 = vmatpush3.bf16.msra.mxu0 %v575_v2  ;;  %v592_v32 = vld [vmem:[#allocation8 + $0x10] sm:$0xff]   ;;  %v593_v33 = vld [vmem:[#allocation8 + $0x18] sm:$0xff]   ;;  %v594_v34 = vld [vmem:[#allocation8 + $0x20] sm:$0xff]  }
  0x51   :  { %509 = vmatprep.subr.bf16.mxu0 %v730_v0  ;;  %528 = vmatpush3.bf16.msra.mxu1 %v583_v11  ;;  %v595_v35 = vld [vmem:[#allocation8 + $0x28] sm:$0xff]   ;;  %v596_v36 = vld [vmem:[#allocation8 + $0x30] sm:$0xff]   ;;  %v597_v37 = vld [vmem:[#allocation8 + $0x38] sm:$0xff]  }
  0x52   :  { %529 = vmatprep.subr.bf16.mxu1 %v730_v0  ;;  %v459_v38 = vld [vmem:[%s885_s4] ss:$0 sm:$0xff]  ;;  %s438_s4 = sshll.u32 %s732_s28, 4  ;;  %s439_s4 = int_to_ptr.vmem [resolvable:$true] %s438_s4 }
  0x53   :  { %v469_v50 = vld [vmem:[%s887_s6] ss:$0 sm:$0xff]  ;;  %s694_s29 = scalar_lea.vmem %s439_s4, 128  ;;  %p699_p5 = scmp.lt.s32.totalorder %s439_s4, %s439_s4 }
  0x54   :  { %510 = vmatpush3.bf16.msra.mxu0 %v576_v3  ;;  %p695_p4 = scmp.ne.s32.totalorder %s439_s4, %s694_s29  ;;  %p700_p6 = scmp.lt.s32.totalorder %s694_s29, %s694_s29 }
  0x55   :  { %511 = vmatprep.subr.bf16.mxu0 %v730_v0  ;;  %530 = vmatpush3.bf16.msra.mxu1 %v584_v12 }
  0x56   :  { %531 = vmatprep.subr.bf16.mxu1 %v730_v0  ;;  %p701_p7 = por %p700_p6, %p699_p5 }
  0x58   :  { %512 = vmatpush3.bf16.msra.mxu0 %v577_v4  ;;  %p702_p8 = pnand %p701_p7, %p695_p4 }
  0x59   :  { %513 = vmatprep.subr.bf16.mxu0 %v730_v0  ;;  %532 = vmatpush3.bf16.msra.mxu1 %v585_v13 }
  0x5a   :  { %533 = vmatprep.subr.bf16.mxu1 %v730_v0 }
  0x5c   :  { %514 = vmatpush3.bf16.msra.mxu0 %v578_v5 }
  0x5d   :  { %515 = vmatprep.subr.bf16.mxu0 %v730_v0  ;;  %534 = vmatpush3.bf16.msra.mxu1 %v586_v14 }
  0x5e   :  { %535 = vmatprep.subr.bf16.mxu1 %v730_v0 }
  0x60   :  { %516 = vmatpush3.bf16.msra.mxu0 %v579_v6 }
  0x61   :  { %517 = vmatprep.subr.bf16.mxu0 %v730_v0  ;;  %536 = vmatpush3.bf16.msra.mxu1 %v587_v15 }
  0x62   :  { %537 = vmatprep.subr.bf16.mxu1 %v730_v0 }
  0x64   :  { %518 = vmatpush3.bf16.msra.mxu0 %v580_v7 }
  0x65   :  { %519 = vmatprep.subr.bf16.mxu0 %v730_v0  ;;  %538 = vmatpush3.bf16.msra.mxu1 %v588_v16 }
  0x66   :  { %539 = vmatprep.subr.bf16.mxu1 %v730_v0 }
  0x68   :  { %520 = vmatpush3.bf16.msra.mxu0 %v581_v8 }
  0x69   :  { %545 = vmatprep.subr.bf16.mxu0 %v730_v0  ;;  %540 = vmatpush3.bf16.msra.mxu1 %v589_v17 }
  0x6b   :  { %522 = vmatmul.mubr.bf16.vlgmr.msra.gmra.mrb[0].mxu0 %v81_v9 }
  0x6c   :  { %561 = vmatprep.mubr.msk.bf16.mxu0 %vm731_vm0, %v730_v0  ;;  %546 = vmatpush3.bf16.msra.mxu0 %v590_v30 }
  0x6d   :  { %547 = vmatprep.subr.bf16.mxu0 %v730_v0 }
  0x70   :  { %548 = vmatpush3.bf16.msra.mxu0 %v591_v31 }
  0x71   :  { %549 = vmatprep.subr.bf16.mxu0 %v730_v0 }
  0x74   :  { %550 = vmatpush3.bf16.msra.mxu0 %v592_v32 }
  0x75   :  { %551 = vmatprep.subr.bf16.mxu0 %v730_v0 }
  0x78   :  { %552 = vmatpush3.bf16.msra.mxu0 %v593_v33 }
  0x79   :  { %553 = vmatprep.subr.bf16.mxu0 %v730_v0 }
  0x7c   :  { %554 = vmatpush3.bf16.msra.mxu0 %v594_v34 }
  0x7d   :  { %555 = vmatprep.subr.bf16.mxu0 %v730_v0 }
  0x80   :  { %556 = vmatpush3.bf16.msra.mxu0 %v595_v35 }
  0x81   :  { %557 = vmatprep.subr.bf16.mxu0 %v730_v0 }
  0x84   :  { %558 = vmatpush3.bf16.msra.mxu0 %v596_v36 }
  0x85   :  { %559 = vmatprep.subr.bf16.mxu0 %v730_v0 }
  0x88   :  { %560 = vmatpush3.bf16.msra.mxu0 %v597_v37 }
 0x13e   :  { %v187_v19 = vpop.f32.mrb[0].mxu0 }
 0x13f   :  { %v188_v20 = vadd.f32 %v449_v18, %v187_v19  ;;  %v523_v21 = vpop.f32.mrb[1].mxu0 }
 0x140   :  { %v190_v22 = vpop.f32.mrb[2].mxu0 }
 0x141   :  { %v458_v23 = vmul.f32 -1.442695, %v188_v20  ;;  %v524_v24 = vpop.f32.mrb[3].mxu0 }
 0x143   :  { %598 = vpow2.f32 %v458_v23 }
 0x14d   :  { %v599_v25 = vpop.eup %598 }
 0x14e   :  { %v196_v26 = vadd.f32 1.0, %v599_v25 }
 0x150   :  { %600 = vrcp.f32 %v196_v26 }
 0x15a   :  { %v601_v27 = vpop.eup %600 }
 0x15b   :  { %v199_v28 = vmul.f32 %v601_v27, %v188_v20 }
 0x15d   :  { %v200_v29 = vpack.c.bf16 %v199_v28, %v199_v28 }
 0x15f   :  { %542 = vmatmul.mubr.bf16.vlgmr.msra.gmra.mrb[0].mxu1 %v200_v29 }
 0x232   :  { %v306_v39 = vpop.f32.mrb[0].mxu1 }
 0x233   :  { %v307_v40 = vadd.f32 %v459_v38, %v306_v39  ;;  %v543_v41 = vpop.f32.mrb[1].mxu1 }
 0x234   :  { %v309_v42 = vpop.f32.mrb[2].mxu1 }
 0x235   :  { %v468_v43 = vmul.f32 -1.442695, %v307_v40  ;;  %v544_v44 = vpop.f32.mrb[3].mxu1 }
 0x237   :  { %602 = vpow2.f32 %v468_v43 }
 0x241   :  { %v603_v45 = vpop.eup %602 }
 0x242   :  { %v315_v46 = vadd.f32 1.0, %v603_v45 }
 0x244   :  { %604 = vrcp.f32 %v315_v46 }
 0x24e   :  { %v605_v47 = vpop.eup %604 }
 0x24f   :  { %v318_v48 = vmul.f32 %v605_v47, %v307_v40 }
 0x251   :  { %v319_v49 = vpack.c.bf16 %v318_v48, %v318_v48 }
 0x253   :  { %562 = vmatmul.mubr.bf16.vlgmr.msra.gmra.mrb[4].mxu0 %v319_v49 }
 0x326   :  { %v425_v51 = vpop.f32.mrb[4].mxu0 }
 0x327   :  { %v426_v52 = vadd.f32 %v469_v50, %v425_v51  ;;  %v563_v53 = vpop.f32.mrb[5].mxu0 }
 0x328   :  { %v428_v54 = vpop.f32.mrb[6].mxu0 }
 0x329   :  { %431 = vst [vmem:[#allocation10] sm:$0xff] %v426_v52  ;;  %v564_v55 = vpop.f32.mrb[7].mxu0 }
 0x32a   :  { %705 = shalt.err (!%p702_p8)
}
 0x32b   :  { %s706_s6 = scalar_lea.hbm %s888_s7, 128 }
 0x32c   :  { %p707_p9 = scmp.ne.s32.totalorder %s888_s7, %s706_s6  ;;  %p710_p10 = scmp.lt.u32.totalorder %s706_s6, %s888_s7 }
 0x32e   :  { %p712_p11 = pnand %p710_p10, %p707_p9 }
 0x330   :  { %715 = shalt.err (!%p712_p11)
}
 0x331   :  { %441 = dma.vmem_to_hbm [thread:$0]  %s439_s4, 128, %s888_s7, [#allocation4]  }
 0x332   :  { %722 = dma.done.wait [#allocation4], 128  }
 0x333   :  { %723 = vsyncadd [#allocation4], 4294967168 }
 0x334   :  { %445 = vsyncpa [#allocation3], 1 }
 0x335   :  { %446 = vsyncpa [#allocation6], 1 }
 0x336   :  { %447 = vsyncpa [#allocation9], 1 }
 0x337   :  { %448 = vsyncpa [#allocation4], 1 }

</bundles_post_ra>
